<compile_context>
chip_gen: v5e
topology: v5e:2x2
jax: 0.10.0
libtpu: 0.0.40
codegen_flags: <defaults>
</compile_context>

<pallas_src>
import functools

import jax
import jax.numpy as jnp
from jax.experimental import pallas as pl
from jax.experimental.pallas import tpu as pltpu


def _round_up(x, m):
    return (x + m - 1) // m * m


# ---------------------------------------------------------------------------
# Path A: weights fully resident in VMEM.  Grid = (token tiles,).
# ---------------------------------------------------------------------------
def _ffn_resident_kernel(x_ref, w1_ref, b1_ref, w2_ref, b2_ref, o_ref):
    # x_ref:  (tm, d_model) bf16     w1_ref: (d_model, d_ff) bf16 (resident)
    # b1_ref: (1, d_ff) f32          w2_ref: (d_ff, d_model) bf16 (resident)
    # b2_ref: (1, d_model) f32       o_ref:  (tm, d_model)
    h = jnp.dot(x_ref[...], w1_ref[...], preferred_element_type=jnp.float32)
    h = jnp.maximum(h + b1_ref[...], 0.0)
    out = jnp.dot(h.astype(w2_ref.dtype), w2_ref[...],
                  preferred_element_type=jnp.float32)
    o_ref[...] = (out + b2_ref[...]).astype(o_ref.dtype)


# ---------------------------------------------------------------------------
# Path B: d_ff-streaming fallback.  Grid = (token tiles, d_ff tiles).
# ---------------------------------------------------------------------------
def _ffn_stream_kernel(x_ref, w1_ref, b1_ref, w2_ref, b2_ref, o_ref, acc_ref,
                       *, tk):
    # x_ref:  (tm, d_model) bf16     w1_ref: (d_model, tk) bf16 slice
    # b1_ref: (1, d_ff) f32 resident w2_ref: (tk, d_model) bf16 slice
    # b2_ref: (1, d_model) f32       acc_ref:(tm, d_model) f32 scratch
    k = pl.program_id(1)

    @pl.when(k == 0)
    def _():
        acc_ref[...] = jnp.zeros_like(acc_ref)

    start = pl.multiple_of(k * tk, tk)
    h = jnp.dot(x_ref[...], w1_ref[...], preferred_element_type=jnp.float32)
    h = jnp.maximum(h + b1_ref[:, pl.ds(start, tk)], 0.0)
    acc_ref[...] += jnp.dot(h.astype(w2_ref.dtype), w2_ref[...],
                            preferred_element_type=jnp.float32)

    @pl.when(k == pl.num_programs(1) - 1)
    def _():
        o_ref[...] = (acc_ref[...] + b2_ref[...]).astype(o_ref.dtype)


@functools.partial(jax.jit, static_argnames=("tm", "tk", "force_streaming"))
def position_wise_feed_forward(x, w1, b1, w2, b2, *, tm=512, tk=2048,
                               force_streaming=False):
    """FFN forward: relu(x @ w1 + b1) @ w2 + b2.

    x: (batch, seq, d_model) -> (batch, seq, d_model).
    Weights are stored transposed relative to PyTorch nn.Linear:
      w1 (d_model, d_ff), w2 (d_ff, d_model).
    For best performance pass w1/w2 already cast to bfloat16 (the in-jit
    astype is then a no-op, avoiding an extra HBM cast pass per call)."""
    batch, seq, d_model = x.shape
    d_ff = w1.shape[1]
    tokens = batch * seq
    out_dtype = x.dtype

    # ---- token-tile selection (all static, derived from shapes) -----------
    tm = int(min(int(tm), _round_up(tokens, 8)))
    # Prefer >= 2 token tiles so the "parallel" axis can shard across the two
    # TensorCores of a v7x chip (harmless on single-TC v5e/v6e).
    if tokens > 8 and pl.cdiv(tokens, tm) < 2:
        tm = max(8, _round_up(pl.cdiv(tokens, 2), 8))
    n_i = pl.cdiv(tokens, tm)
    tokens_padded = n_i * tm

    x2d = x.reshape(tokens, d_model)
    if tokens_padded != tokens:
        x2d = jnp.pad(x2d, ((0, tokens_padded - tokens), (0, 0)))

    # bf16 data/weights on the MXU; f32 accumulation in-kernel.
    x_b = x2d.astype(jnp.bfloat16)
    w1_b = w1.astype(jnp.bfloat16)
    w2_b = w2.astype(jnp.bfloat16)
    b1_2d = b1.reshape(1, d_ff).astype(jnp.float32)
    b2_2d = b2.reshape(1, d_model).astype(jnp.float32)

    out_itemsize = jnp.dtype(out_dtype).itemsize
    flops = 4 * tokens_padded * d_model * d_ff          # two matmuls

    # ---- VMEM budget per chip generation -----------------------------------
    try:
        vmem_cap = pltpu.get_tpu_info().vmem_capacity_bytes
    except Exception:
        vmem_cap = 64 * 1024 * 1024                     # conservative (v7x)
    vmem_limit = int(min(0.75 * vmem_cap, 100 * 1024 * 1024))

    # ---- Path A feasibility: full weight residency --------------------------
    weight_bytes = 2 * d_model * d_ff * 2               # w1 + w2 in bf16
    resident_vmem = (2 * weight_bytes                    # default double-buffer
                     + tm * d_ff * 4                     # (tm, d_ff) f32 h
                     + 2 * tm * d_model * (2 + out_itemsize) * 2  # x/out tiles
                     + (d_ff + d_model) * 4 * 2)         # biases
    use_resident = (not force_streaming) and resident_vmem <= int(0.8 * vmem_limit)

    if use_resident:
        bytes_accessed = (x_b.size * 2 + weight_bytes
                          + b1_2d.size * 4 + b2_2d.size * 4
                          + tokens_padded * d_model * out_itemsize)
        out2d = pl.pallas_call(
            _ffn_resident_kernel,
            out_shape=jax.ShapeDtypeStruct((tokens_padded, d_model), out_dtype),
            grid_spec=pltpu.PrefetchScalarGridSpec(
                num_scalar_prefetch=0,
                grid=(n_i,),
                in_specs=[
                    pl.BlockSpec((tm, d_model), lambda i: (i, 0)),     # x tile
                    pl.BlockSpec((d_model, d_ff), lambda i: (0, 0)),   # w1 resident
                    pl.BlockSpec((1, d_ff), lambda i: (0, 0)),         # b1 resident
                    pl.BlockSpec((d_ff, d_model), lambda i: (0, 0)),   # w2 resident
                    pl.BlockSpec((1, d_model), lambda i: (0, 0)),      # b2 resident
                ],
                out_specs=pl.BlockSpec((tm, d_model), lambda i: (i, 0)),
            ),
            compiler_params=pltpu.CompilerParams(
                dimension_semantics=("parallel",),
                vmem_limit_bytes=vmem_limit,
            ),
            cost_estimate=pl.CostEstimate(
                flops=flops, transcendentals=0,
                bytes_accessed=int(bytes_accessed)),
        )(x_b, w1_b, b1_2d, w2_b, b2_2d)
    else:
        # ---- Path B: stream d_ff with f32 accumulation ----------------------
        tk = int(min(int(tk), d_ff))
        assert d_ff % tk == 0, "d_ff must be divisible by tk"
        assert tk == d_ff or tk % 128 == 0, "tk must be a multiple of 128"
        n_k = d_ff // tk
        bytes_accessed = (x_b.size * 2
                          + n_i * (w1_b.size * 2 + w2_b.size * 2)  # re-streamed
                          + b1_2d.size * 4 + b2_2d.size * 4
                          + tokens_padded * d_model * out_itemsize)
        out2d = pl.pallas_call(
            functools.partial(_ffn_stream_kernel, tk=tk),
            out_shape=jax.ShapeDtypeStruct((tokens_padded, d_model), out_dtype),
            grid_spec=pltpu.PrefetchScalarGridSpec(
                num_scalar_prefetch=0,
                grid=(n_i, n_k),                          # reduction axis last
                in_specs=[
                    pl.BlockSpec((tm, d_model), lambda i, k: (i, 0)),   # x tile
                    pl.BlockSpec((d_model, tk), lambda i, k: (0, k)),   # w1 slice
                    pl.BlockSpec((1, d_ff), lambda i, k: (0, 0)),       # b1 resident
                    pl.BlockSpec((tk, d_model), lambda i, k: (k, 0)),   # w2 slice
                    pl.BlockSpec((1, d_model), lambda i, k: (0, 0)),    # b2
                ],
                out_specs=pl.BlockSpec((tm, d_model), lambda i, k: (i, 0)),
                scratch_shapes=[pltpu.VMEM((tm, d_model), jnp.float32)],
            ),
            compiler_params=pltpu.CompilerParams(
                dimension_semantics=("parallel", "arbitrary"),
                vmem_limit_bytes=vmem_limit,
            ),
            cost_estimate=pl.CostEstimate(
                flops=flops, transcendentals=0,
                bytes_accessed=int(bytes_accessed)),
        )(x_b, w1_b, b1_2d, w2_b, b2_2d)

    if tokens_padded != tokens:
        out2d = out2d[:tokens]
    return out2d.reshape(batch, seq, d_model)


def init_params(key, d_model, d_ff, dtype=jnp.float32):
    """nn.Linear-style init (U[-1/sqrt(fan_in), 1/sqrt(fan_in)]).

    Weights are stored transposed relative to PyTorch: (in, out)."""
    k1, k2, k3, k4 = jax.random.split(key, 4)
    lim1 = 1.0 / (d_model ** 0.5)
    lim2 = 1.0 / (d_ff ** 0.5)
    w1 = jax.random.uniform(k1, (d_model, d_ff), dtype, -lim1, lim1)
    b1 = jax.random.uniform(k2, (d_ff,), dtype, -lim1, lim1)
    w2 = jax.random.uniform(k3, (d_ff, d_model), dtype, -lim2, lim2)
    b2 = jax.random.uniform(k4, (d_model,), dtype, -lim2, lim2)
    return w1, b1, w2, b2


if __name__ == "__main__":
    # Small shapes consistent with the module (module defaults are 512/2048).
    batch, seq, dm, dff = 2, 8, 128, 256

    key = jax.random.PRNGKey(0)
    kx, kp = jax.random.split(key)
    x = jax.random.normal(kx, (batch, seq, dm), jnp.float32)
    w1, b1, w2, b2 = init_params(kp, dm, dff)

    # Hoisted casts: weights are pre-cast to bf16 once, outside the jitted call.
    w1_b = w1.astype(jnp.bfloat16)
    w2_b = w2.astype(jnp.bfloat16)
    b1_f = b1.astype(jnp.float32)
    b2_f = b2.astype(jnp.float32)

    # Pure-JAX f32 reference; kernel uses bf16 data/weights with f32
    # accumulation, hence the loosened tolerance.
    ref = jnp.maximum(x @ w1 + b1, 0.0) @ w2 + b2

    # Path A: resident-weight kernel (default for these sizes).
    out = position_wise_feed_forward(x, w1_b, b1_f, w2_b, b2_f)
    out = jax.block_until_ready(out)
    assert out.shape == (batch, seq, dm)
    assert jnp.allclose(out, ref, atol=2e-2, rtol=2e-2), (
        float(jnp.max(jnp.abs(out - ref))))

    # Path B: d_ff-streaming fallback (exercises the accumulator / pl.when path).
    out_s = position_wise_feed_forward(x, w1_b, b1_f, w2_b, b2_f,
                                       tk=128, force_streaming=True)
    out_s = jax.block_until_ready(out_s)
    assert jnp.allclose(out_s, ref, atol=2e-2, rtol=2e-2), (
        float(jnp.max(jnp.abs(out_s - ref))))

    print("KERNEL_OK")
</pallas_src>

<mosaic_0001>
module attributes {stable_mosaic.version = 11 : i64} {
  func.func @_ffn_resident_kernel(%arg0: i32, %arg1: memref<8x128xbf16, #tpu.memory_space<vmem>>, %arg2: memref<128x256xbf16, #tpu.memory_space<vmem>>, %arg3: memref<1x256xf32, #tpu.memory_space<vmem>>, %arg4: memref<256x128xbf16, #tpu.memory_space<vmem>>, %arg5: memref<1x128xf32, #tpu.memory_space<vmem>>, %arg6: memref<8x128xf32, #tpu.memory_space<vmem>>) attributes {dimension_semantics = [#tpu.dimension_semantics<parallel>], iteration_bounds = array<i64: 2>, scalar_prefetch = 0 : i64, scratch_operands = 0 : i64, tpu.core_type = #tpu.core_type<tc>, window_params = [{transform_indices = @transform_0, window_bounds = array<i64: 8, 128>}, {pipeline_mode = #tpu.pipeline_mode<synchronous>, transform_indices = @transform_1, window_bounds = array<i64: 128, 256>}, {pipeline_mode = #tpu.pipeline_mode<synchronous>, transform_indices = @transform_2, window_bounds = array<i64: 1, 256>}, {pipeline_mode = #tpu.pipeline_mode<synchronous>, transform_indices = @transform_3, window_bounds = array<i64: 256, 128>}, {pipeline_mode = #tpu.pipeline_mode<synchronous>, transform_indices = @transform_4, window_bounds = array<i64: 1, 128>}, {transform_indices = @transform_5, window_bounds = array<i64: 8, 128>}]} {
    %c0 = arith.constant 0 : index
    %c0_0 = arith.constant 0 : index
    %0 = vector.load %arg1[%c0, %c0_0] : memref<8x128xbf16, #tpu.memory_space<vmem>>, vector<8x128xbf16>
    %c0_1 = arith.constant 0 : index
    %c0_2 = arith.constant 0 : index
    %1 = vector.load %arg2[%c0_1, %c0_2] : memref<128x256xbf16, #tpu.memory_space<vmem>>, vector<128x256xbf16>
    %cst = arith.constant dense<0.000000e+00> : vector<8x256xf32>
    %2 = tpu.matmul %0, %1, %cst {dimension_numbers = #tpu.dot_dimension_numbers<[1], [0], [0], [1], [0, 0, 1, 1], [], []>} : vector<8x128xbf16>, vector<128x256xbf16>, vector<8x256xf32> -> vector<8x256xf32>
    %c0_3 = arith.constant 0 : index
    %c0_4 = arith.constant 0 : index
    %3 = vector.load %arg3[%c0_3, %c0_4] : memref<1x256xf32, #tpu.memory_space<vmem>>, vector<1x256xf32>
    %4 = vector.broadcast %3 : vector<1x256xf32> to vector<8x256xf32>
    %5 = arith.addf %2, %4 : vector<8x256xf32>
    %cst_5 = arith.constant 0.000000e+00 : f32
    %6 = vector.broadcast %cst_5 : f32 to vector<8x256xf32>
    %7 = arith.maximumf %5, %6 : vector<8x256xf32>
    %8 = arith.truncf %7 : vector<8x256xf32> to vector<8x256xbf16>
    %c0_6 = arith.constant 0 : index
    %c0_7 = arith.constant 0 : index
    %9 = vector.load %arg4[%c0_6, %c0_7] : memref<256x128xbf16, #tpu.memory_space<vmem>>, vector<256x128xbf16>
    %cst_8 = arith.constant dense<0.000000e+00> : vector<8x128xf32>
    %10 = tpu.matmul %8, %9, %cst_8 {dimension_numbers = #tpu.dot_dimension_numbers<[1], [0], [0], [1], [0, 0, 1, 1], [], []>} : vector<8x256xbf16>, vector<256x128xbf16>, vector<8x128xf32> -> vector<8x128xf32>
    %c0_9 = arith.constant 0 : index
    %c0_10 = arith.constant 0 : index
    %11 = vector.load %arg5[%c0_9, %c0_10] : memref<1x128xf32, #tpu.memory_space<vmem>>, vector<1x128xf32>
    %12 = vector.broadcast %11 : vector<1x128xf32> to vector<8x128xf32>
    %13 = arith.addf %10, %12 : vector<8x128xf32>
    %c0_11 = arith.constant 0 : index
    %c0_12 = arith.constant 0 : index
    %14 = vector.load %arg6[%c0_11, %c0_12] : memref<8x128xf32, #tpu.memory_space<vmem>>, vector<8x128xf32>
    tpu.vector_store %arg6[%c0_11, %c0_12], %13 {strides = array<i32>} : memref<8x128xf32, #tpu.memory_space<vmem>>, vector<8x128xf32>,
    return
  }
  func.func @transform_0(%arg0: i32) -> (i32, i32) {
    %c0_i32 = arith.constant 0 : i32
    %c0_i32_0 = arith.constant 0 : i32
    return %arg0, %c0_i32 : i32, i32
  }
  func.func @transform_1(%arg0: i32) -> (i32, i32) {
    %c0_i32 = arith.constant 0 : i32
    %c0_i32_0 = arith.constant 0 : i32
    %c0_i32_1 = arith.constant 0 : i32
    return %c0_i32, %c0_i32_0 : i32, i32
  }
  func.func @transform_2(%arg0: i32) -> (i32, i32) {
    %c0_i32 = arith.constant 0 : i32
    %c0_i32_0 = arith.constant 0 : i32
    %c0_i32_1 = arith.constant 0 : i32
    return %c0_i32, %c0_i32_0 : i32, i32
  }
  func.func @transform_3(%arg0: i32) -> (i32, i32) {
    %c0_i32 = arith.constant 0 : i32
    %c0_i32_0 = arith.constant 0 : i32
    %c0_i32_1 = arith.constant 0 : i32
    return %c0_i32, %c0_i32_0 : i32, i32
  }
  func.func @transform_4(%arg0: i32) -> (i32, i32) {
    %c0_i32 = arith.constant 0 : i32
    %c0_i32_0 = arith.constant 0 : i32
    %c0_i32_1 = arith.constant 0 : i32
    return %c0_i32, %c0_i32_0 : i32, i32
  }
  func.func @transform_5(%arg0: i32) -> (i32, i32) {
    %c0_i32 = arith.constant 0 : i32
    %c0_i32_0 = arith.constant 0 : i32
    return %arg0, %c0_i32 : i32, i32
  }
}

</mosaic_0001>

<bundles_post_ra>
// kernel: position_wise_feed_forward.1
= control target key start
LH: loop header
LB: loop body
LE: loop exit
PB: predicated region body
PF: predicated region fallthrough
CT: control target
= control target key end

     0   :  { %10 = vsyncpa [#allocation3], 0  ;;  %s1166_s0 = inlined_call_operand.vmem [shape: bf16[16,128], index: 0, kind: input, shape index: {}]   ;;  %s1167_s1 = inlined_call_operand.hbm [shape: bf16[128,256], index: 1, kind: input, shape index: {}]   ;;  %s1168_s2 = inlined_call_operand.vmem [shape: f32[1,256], index: 2, kind: input, shape index: {}]   ;;  %s1169_s3 = inlined_call_operand.hbm [shape: bf16[256,128], index: 3, kind: input, shape index: {}]   ;;  %s1170_s4 = inlined_call_operand.vmem [shape: f32[1,128], index: 4, kind: input, shape index: {}]   ;;  %s1171_s5 = inlined_call_operand.hbm [shape: f32[16,128], index: 5, kind: output, shape index: {}]  }
   0x1   :  { %11 = vsyncpa [#allocation6], 0 }
   0x2   :  { %12 = vsyncpa [#allocation4], 0 }
   0x3   :  { %14 = vsyncpa [#allocation4 + $0x1], 0  ;;  %s1050_s18 = smov 0   ;;  %s1052_s19 = smov 0  }
   0x4   :  { %s1054_s20 = smov 0   ;;  %s1056_s21 = smov 0  }
   0x5 LB: > { %s1071_s22 = sadd.s32 4294967295, %s1012_s21   ;;  %s643_s23 = sadd.s32 4294967294, %s1012_s21   ;;  %s1012_s21 = sphi %s1056_s21, %s1178_s21   ;;  %s1008_s20 = sphi %s1054_s20, %s1177_s20   ;;  %s1004_s19 = sphi %s1052_s19, %s1176_s19   ;;  %s1000_s18 = sphi %s1050_s18, %s1175_s18  }
   0x6   : > { %s1075_s24 = sadd.s32 1, %s1012_s21   ;;  %s137_s25 = sadd.s32 1, %s1008_s20 }
   0x7   : > { %s134_s26 = ssub.s32 %s1012_s21, %s1075_s24  ;;  %p147_p0 = scmp.ne.s32.totalorder %s1008_s20, %s1004_s19 }
   0x8   : > { %p135_p1 = scmp.eq.s32.totalorder %s134_s26, 0  ;;  %p148_p2 = scmp.eq.s32.totalorder %s1071_s22, 1 }
   0x9   : > { %p153_p3 = scmp.ne.s32.totalorder %s1004_s19, %s1000_s18  ;;  %p154_p4 = scmp.eq.s32.totalorder %s643_s23, 1 }
   0xa   : > { %s1086_s27 = scalar_select %p135_p1, %s1008_s20, %s137_s25  }
   0xb   : > { %p1088_p5 = por %p148_p2, %p147_p0  ;;  %p1092_p6 = por %p154_p4, %p153_p3 }
   0xc   : > { %p644_p7 = scmp.ge.s32.totalorder %s1012_s21, 1  ;;  %p161_p8 = scmp.lt.s32.totalorder %s1012_s21, 3 }
   0xd   : > { %p838_p9 = scmp.eq.s32.totalorder %s1071_s22, 0  ;;  %s172_s8 = sshll.u32 %s1167_s1, 4  ;;  %s173_s8 = int_to_ptr.hbm [resolvable:$true] %s172_s8 }
   0xe   : > { %p1099_p10 = pnand %p644_p7, %p161_p8  ;;  %s1014_s9 = smov [#allocation2]  }
   0xf   : > { %s174_s10 = sshll.u32 %s1014_s9, 4  ;;  %s189_s13 = sshll.u32 %s1169_s3, 4  ;;  %s175_s10 = int_to_ptr.vmem [resolvable:$true] %s174_s10  ;;  %s190_s13 = int_to_ptr.hbm [resolvable:$true] %s189_s13 }
  0x10   : > { %p827_p11 = pneg %p1099_p10  ;;  %s1015_s14 = smov 128  }
  0x11   : > { %s1016_s15 = smov 8   ;;  %s1017_s16 = smov [#allocation5]  }
  0x12   : > { %p828_p12 = pnand %p838_p9, %p827_p11  ;;  %s191_s17 = sshll.u32 %s1017_s16, 4  ;;  %s192_s17 = int_to_ptr.vmem [resolvable:$true] %s191_s17 }
  0x13   : > { %s1018_s23 = smov 64   ;;  %s1019_s25 = smov 4  }
  0x14   : > { %830 = dma.hbm_to_vmem [thread:$0]  (!%p828_p12), %s173_s8, 2048, %s175_s10, [#allocation3], %s1015_s14, %s1015_s14, %s1016_s15  }
  0x15   : > { %833 = dma.hbm_to_vmem [thread:$0]  (!%p828_p12), %s190_s13, 2048, %s192_s17, [#allocation6], %s1018_s23, %s1018_s23, %s1019_s25  }
  0x16   : > { %217 = sbr.rel (%p1099_p10) target bundleno = 337 (0x151), region = 40 }
  0x1b   : > { %987 = dma.done.wait (%p838_p9), [#allocation3], 2048  }
  0x1c   : > { %989 = vsyncadd (%p838_p9), [#allocation3], 4294965248 }
  0x1d   : > { %991 = dma.done.wait (%p838_p9), [#allocation6], 2048  }
  0x1e   : > { %993 = vsyncadd (%p838_p9), [#allocation6], 4294965248  ;;  %v711_v0 = vld [vmem:[#allocation2 + $0x70] sm:$0xf]  ;;  %v800_v1 = vld [vmem:[#allocation2 + $0x74] sm:$0xf0] }
  0x1f   : > { %v799_v2 = vld [vmem:[#allocation2 + $0x74] sm:$0xf]  ;;  %v712_v3 = vor.u32 %v800_v1, %v711_v0  ;;  %v713_v4 = vld [vmem:[#allocation2 + $0x78] sm:$0xf0]  ;;  %v703_v5 = vld [vmem:[#allocation2 + $0x60] sm:$0xf] }
  0x20   : > { %v798_v6 = vld [vmem:[#allocation2 + $0x64] sm:$0xf0]  ;;  %v716_v7 = vor.u32 %v799_v2, %v713_v4  ;;  %v797_v8 = vld [vmem:[#allocation2 + $0x64] sm:$0xf]  ;;  %v705_v9 = vld [vmem:[#allocation2 + $0x68] sm:$0xf0] }
  0x21   : > { %357 = vmatpush.bf16.msra.mxu0 %v712_v3  ;;  %v704_v10 = vor.u32 %v798_v6, %v703_v5  ;;  %v708_v11 = vor.u32 %v797_v8, %v705_v9  ;;  %v695_v12 = vld [vmem:[#allocation2 + $0x50] sm:$0xf]  ;;  %v796_v13 = vld [vmem:[#allocation2 + $0x54] sm:$0xf0]  ;;  %v795_v14 = vld [vmem:[#allocation2 + $0x54] sm:$0xf] }
  0x22   : > { %370 = vmatpush.bf16.msra.mxu1 %v716_v7  ;;  %v697_v15 = vld [vmem:[#allocation2 + $0x58] sm:$0xf0]  ;;  %v696_v16 = vor.u32 %v796_v13, %v695_v12  ;;  %v687_v18 = vld [vmem:[#allocation2 + $0x40] sm:$0xf]  ;;  %v794_v19 = vld [vmem:[#allocation2 + $0x44] sm:$0xf0] }
  0x23   : > { %v700_v17 = vor.u32 %v795_v14, %v697_v15  ;;  %v793_v20 = vld [vmem:[#allocation2 + $0x44] sm:$0xf]  ;;  %v689_v21 = vld [vmem:[#allocation2 + $0x48] sm:$0xf0]  ;;  %v688_v22 = vor.u32 %v794_v19, %v687_v18  ;;  %v808_v23 = vld [vmem:[#allocation5 + $0x38] sm:$0xff]  ;;  %p250_p13 = scmp.lt.s32.totalorder %s1071_s22, 1 }
  0x24   : > { %v816_v24 = vld [vmem:[#allocation5 + $0x78] sm:$0xff]  ;;  %v692_v25 = vor.u32 %v793_v20, %v689_v21  ;;  %v679_v26 = vld [vmem:[#allocation2 + $0x30] sm:$0xf]  ;;  %v791_v28 = vld [vmem:[#allocation2 + $0x34] sm:$0xf]  ;;  %519 = vmatpush.bf16.msra.mxu2 %v808_v23  ;;  %s247_s11 = sand.u32 1, %s1004_s19  }
  0x25   : > { %358 = vmatpush.bf16.msra.mxu0 %v704_v10  ;;  %v792_v27 = vld [vmem:[#allocation2 + $0x34] sm:$0xf0]  ;;  %v681_v29 = vld [vmem:[#allocation2 + $0x38] sm:$0xf0]  ;;  %532 = vmatpush.bf16.msra.mxu3 %v816_v24  ;;  %v807_v30 = vld [vmem:[#allocation5 + $0x30] sm:$0xff]  ;;  %s251_s26 = scalar_select %p250_p13, %s1071_s22, 1 }
  0x26   : > { %371 = vmatpush.bf16.msra.mxu1 %v708_v11  ;;  %v815_v31 = vld [vmem:[#allocation5 + $0x70] sm:$0xff]  ;;  %v680_v32 = vor.u32 %v792_v27, %v679_v26  ;;  %v684_v33 = vor.u32 %v791_v28, %v681_v29  ;;  %v671_v34 = vld [vmem:[#allocation2 + $0x20] sm:$0xf]  ;;  %v790_v35 = vld [vmem:[#allocation2 + $0x24] sm:$0xf0]  ;;  %s651_s12 = sshll.u32 %s247_s11, 3 }
  0x27   : > { %v789_v36 = vld [vmem:[#allocation2 + $0x24] sm:$0xf]  ;;  %v673_v37 = vld [vmem:[#allocation2 + $0x28] sm:$0xf0]  ;;  %v672_v40 = vor.u32 %v790_v35, %v671_v34  ;;  %v663_v42 = vld [vmem:[#allocation2 + $0x10] sm:$0xf] }
  0x28   : > { %520 = vmatpush.bf16.msra.mxu2 %v807_v30  ;;  %v806_v38 = vld [vmem:[#allocation5 + $0x28] sm:$0xff]  ;;  %v676_v41 = vor.u32 %v789_v36, %v673_v37  ;;  %v788_v43 = vld [vmem:[#allocation2 + $0x14] sm:$0xf0]  ;;  %v787_v44 = vld [vmem:[#allocation2 + $0x14] sm:$0xf]  ;;  %s652_s30 = sshll.u32 %s251_s26, 2 }
  0x29   : > { %359 = vmatpush.bf16.msra.mxu0 %v696_v16  ;;  %533 = vmatpush.bf16.msra.mxu3 %v815_v31  ;;  %v814_v39 = vld [vmem:[#allocation5 + $0x68] sm:$0xff]  ;;  %v665_v45 = vld [vmem:[#allocation2 + $0x18] sm:$0xf0]  ;;  %v805_v46 = vld [vmem:[#allocation5 + $0x20] sm:$0xff]  ;;  %v664_v48 = vor.u32 %v788_v43, %v663_v42  ;;  %s253_s8 = scalar_lea.vmem %s1166_s0, %s652_s30  ;;  %s782_s13 = sshll.u32 %s1071_s22, 3 }
  0x2a   : > { %372 = vmatpush.bf16.msra.mxu1 %v700_v17  ;;  %v813_v47 = vld [vmem:[#allocation5 + $0x60] sm:$0xff]  ;;  %v668_v49 = vor.u32 %v787_v44, %v665_v45  ;;  %v786_v51 = vld [vmem:[#allocation2 + $0x4] sm:$0xf0]  ;;  %v657_v53 = vld [vmem:[#allocation2 + $0x8] sm:$0xf0]  ;;  %s557_s23 = scalar_lea.hbm %s1171_s5, %s782_s13  ;;  %s249_s25 = scalar_lea.vmem [#allocation7], %s651_s12 }
  0x2b   : > { %v655_v50 = vld [vmem:[#allocation2] sm:$0xf]  ;;  %v785_v52 = vld [vmem:[#allocation2 + $0x4] sm:$0xf]  ;;  %v804_v54 = vld [vmem:[#allocation5 + $0x18] sm:$0xff]  ;;  %s559_s26 = sshll.u32 %s249_s25, 4  ;;  %s560_s26 = int_to_ptr.vmem [resolvable:$true] %s559_s26 }
  0x2c   : > { %521 = vmatpush.bf16.msra.mxu2 %v806_v38  ;;  %v812_v55 = vld [vmem:[#allocation5 + $0x58] sm:$0xff]  ;;  %v656_v56 = vor.u32 %v786_v51, %v655_v50  ;;  %v660_v57 = vor.u32 %v785_v52, %v657_v53  ;;  %v803_v58 = vld [vmem:[#allocation5 + $0x10] sm:$0xff]  ;;  %v254_v60 = vld [vmem:[%s253_s8] sm:$0xf]  ;;  %s561_s30 = sshll.u32 %s557_s23, 4  ;;  %s547_s22 = scalar_lea.sflag [#allocation4], %s247_s11  ;;  %s562_s30 = int_to_ptr.hbm [resolvable:$true] %s561_s30 }
  0x2d   : > { %360 = vmatpush.bf16.msra.mxu0 %v688_v22  ;;  %534 = vmatpush.bf16.msra.mxu3 %v814_v39  ;;  %v811_v59 = vld [vmem:[#allocation5 + $0x50] sm:$0xff]  ;;  %v802_v61 = vld [vmem:[#allocation5 + $0x8] sm:$0xff]  ;;  %v801_v63 = vld [vmem:[#allocation5] sm:$0xff]  ;;  %s956_s6 = sshra.s32 %s562_s30, 4  ;;  %s962_s10 = scalar_lea.hbm %s1171_s5, 16  ;;  %s957_s6 = int_to_ptr.hbm [resolvable:$true] %s956_s6 }
  0x2e   : > { %373 = vmatpush.bf16.msra.mxu1 %v692_v25  ;;  %v810_v62 = vld [vmem:[#allocation5 + $0x48] sm:$0xff]  ;;  %v809_v0 = vld [vmem:[#allocation5 + $0x40] sm:$0xff]  ;;  %s958_s7 = scalar_lea.hbm %s957_s6, 8  ;;  %p963_p3 = scmp.lt.s32.totalorder %s957_s6, %s1171_s5 }
  0x2f   : > { %v271_v1 = vld [vmem:[%s1168_s2] sm:$0x3]  ;;  %p959_p0 = scmp.ne.s32.totalorder %s957_s6, %s958_s7  ;;  %p964_p4 = scmp.lt.s32.totalorder %s962_s10, %s958_s7 }
  0x30   : > { %522 = vmatpush.bf16.msra.mxu2 %v805_v46  ;;  %v273_v2 = vperm.slane %v271_v1, 0  ;;  %v274_v3 = vperm.slane %v271_v1, 1  ;;  %v881_v14 = vld [vmem:[%s1170_s4] ss:$0 sm:$0xff] }
  0x31   : > { %361 = vmatpush.bf16.msra.mxu0 %v680_v32  ;;  %535 = vmatpush.bf16.msra.mxu3 %v813_v47  ;;  %p960_p1 = pnand %p959_p0, %p1088_p5  ;;  %p965_p7 = por %p964_p4, %p963_p3 }
  0x32   : > { %374 = vmatpush.bf16.msra.mxu1 %v684_v33 }
  0x33   : > { %p961_p2 = pneg %p960_p1 }
  0x34   : > { %523 = vmatpush.bf16.msra.mxu2 %v804_v54 }
  0x35   : > { %362 = vmatpush.bf16.msra.mxu0 %v672_v40  ;;  %536 = vmatpush.bf16.msra.mxu3 %v812_v55  ;;  %p966_p8 = pnand %p965_p7, %p961_p2 }
  0x36   : > { %375 = vmatpush.bf16.msra.mxu1 %v676_v41 }
  0x38   : > { %524 = vmatpush.bf16.msra.mxu2 %v803_v58 }
  0x39   : > { %363 = vmatpush.bf16.msra.mxu0 %v664_v48  ;;  %537 = vmatpush.bf16.msra.mxu3 %v811_v59 }
  0x3a   : > { %376 = vmatpush.bf16.msra.mxu1 %v668_v49 }
  0x3c   : > { %525 = vmatpush.bf16.msra.mxu2 %v802_v61 }
  0x3d   : > { %364 = vmatpush.bf16.msra.mxu0 %v656_v56  ;;  %538 = vmatpush.bf16.msra.mxu3 %v810_v62 }
  0x3e   : > { %377 = vmatpush.bf16.msra.mxu1 %v660_v57 }
  0x40   : > { %365 = vmatmul.bf16.vlgmr.msra.gmra.mxu0 %v254_v60  ;;  %526 = vmatpush.bf16.msra.mxu2 %v801_v63 }
  0x41   : > { %378 = vmatmul.bf16.vlgmr.msra.gmra.mxu1 %v254_v60  ;;  %539 = vmatpush.bf16.msra.mxu3 %v809_v0 }
  0xbd   : > { %v366_v4 = vpop.f32.mrf.mxu0 }
  0xbe   : > { %v367_v5 = vadd.f32 %v366_v4, %v273_v2  ;;  %v379_v6 = vpop.f32.mrf.mxu1 }
  0xbf   : > { %v380_v7 = vadd.f32 %v379_v6, %v274_v3 }
  0xc0   : > { %v383_v8 = vmax.f32 %v367_v5, 0.0 }
  0xc1   : > { %v384_v9 = vmax.f32 %v380_v7, 0.0 }
  0xc2   : > { %v385_v10 = vpack.c.bf16 %v383_v8, %v383_v8 }
  0xc3   : > { %v386_v11 = vpack.c.bf16 %v384_v9, %v384_v9 }
  0xc4   : > { %527 = vmatmul.bf16.vlgmr.msra.gmra.mxu2 %v385_v10 }
  0xc5   : > { %540 = vmatmul.bf16.vlgmr.msra.gmra.mxu3 %v386_v11  ;;  %v368_v12 = vpop.f32.mrf.mxu0 }
  0xc6   : > { %v381_v13 = vpop.f32.mrf.mxu1 }
 0x147   : > { %v528_v15 = vpop.f32.mrf.mxu2 }
 0x148   : > { %v529_v16 = vadd.f32 %v881_v14, %v528_v15  ;;  %v541_v17 = vpop.f32.mrf.mxu3 }
 0x14a   : > { %v542_v18 = vadd.f32 %v541_v17, %v529_v16 }
 0x14c   : > { %545 = vst [vmem:[%s249_s25] sm:$0xff] %v542_v18 }
 0x14d   : > { %969 = shalt.err (!%p966_p8)
}
 0x14e   : > { %825 = dma.vmem_to_hbm [thread:$0]  (%p1088_p5), %s560_s26, 128, %s562_s30, %s547_s22  }
 0x14f   : > { %v530_v19 = vpop.f32.mrf.mxu2 }
 0x150   : > { %v543_v20 = vpop.f32.mrf.mxu3 }
 0x151 PF: > { %p842_p9 = scmp.ge.s32.totalorder %s1012_s21, 2  ;;  %s573_s11 = sand.u32 1, %s1000_s18  }
 0x152   : > { %s574_s14 = scalar_lea.sflag [#allocation4], %s573_s11 }
 0x153   : > { %p835_p10 = pnand %p842_p9, %p1092_p6 }
 0x155   : > { %p836_p11 = pneg %p835_p10 }
 0x157   : > { %995 = dma.done.wait (%p836_p11), %s574_s14, 128  }
 0x158   : > { %997 = vsyncadd (%p836_p11), %s574_s14, 4294967168  ;;  %p17_p5 = scmp.ge.s32.totalorder %s1075_s24, 4   ;;  %s1175_s18 = smov %s1004_s19 }
 0x159   : > { %s1176_s19 = smov %s1008_s20  ;;  %s1177_s20 = smov %s1086_s27 }
 0x15a   : > { %s1178_s21 = smov %s1075_s24  ;;  %19 = sbr.rel (!%p17_p5) target bundleno = 5 (0x5), region = 84 }
 0x15f   :  { %580 = vsyncpa [#allocation3], 1 }
 0x160   :  { %582 = vsyncpa [#allocation3 + $0x1], 1 }
 0x161   :  { %583 = vsyncpa [#allocation6], 1 }
 0x162   :  { %584 = vsyncpa [#allocation4], 1 }
 0x163   :  { %586 = vsyncpa [#allocation4 + $0x1], 1 }

</bundles_post_ra>
